<compile_context>
chip_gen: v5e
topology: v5e:2x2
jax: 0.10.0
libtpu: 0.0.40
codegen_flags: <defaults>
</compile_context>

<pallas_src>
import jax
import jax.numpy as jnp
from jax.experimental import pallas as pl
from jax.experimental.pallas import tpu as pltpu


def _round_up(n, m):
    return ((n + m - 1) // m) * m


def _mlp_kernel(x_ref, w1_ref, b1_ref, w2_ref, b2_ref, o_ref, acc_ref):
    k = pl.program_id(1)

    @pl.when(k == 0)
    def _init():
        acc_ref[...] = jnp.zeros_like(acc_ref)

    # fc1 partial product over this hidden chunk: (tm, C_in) @ (C_in, tk).
    # Feed the MXU same-dtype operands (bf16 x bf16 when params are bf16),
    # accumulate in f32.
    x = x_ref[...]
    if x.dtype != w1_ref.dtype:
        x = x.astype(w1_ref.dtype)
    h = jnp.dot(x, w1_ref[...], preferred_element_type=jnp.float32)
    h = h + b1_ref[...].astype(jnp.float32)

    # tanh-approximation GELU (exactly the reference GELU module), f32 on VPU/EUP.
    c = jnp.float32(0.7978845608028654)  # sqrt(2/pi)
    h = 0.5 * h * (1.0 + jnp.tanh(c * (h + 0.044715 * (h * h * h))))

    # dropout(p=0.0) -> identity

    # fc2 partial sum for this hidden chunk, accumulated in f32 scratch.
    h = h.astype(w2_ref.dtype)
    acc_ref[...] += jnp.dot(h, w2_ref[...], preferred_element_type=jnp.float32)

    @pl.when(k == pl.num_programs(1) - 1)
    def _finalize():
        y = acc_ref[...] + b2_ref[...].astype(jnp.float32)
        o_ref[...] = y.astype(o_ref.dtype)  # dropout(p=0.0) -> identity


def _default_vmem_limit_bytes():
    # Per-generation budget: ~85% of physical VMEM, capped near the measured
    # ~100 MiB sweet spot for v5e/v6e; naturally lands at ~54 MiB on v7x.
    try:
        cap = pltpu.get_tpu_info().vmem_capacity_bytes
    except Exception:
        cap = 64 * 1024 * 1024  # conservative fallback (fits every generation)
    return int(min(cap * 0.85, 110 * 1024 * 1024))


def mlp_pallas(x, w1, b1, w2, b2, *, tm=512, tk=None, vmem_limit_bytes=None):
    """x: (B, N, in_features). Returns (B, N, out_features)."""
    B, N, C_in = x.shape
    C_hidden = w1.shape[1]
    C_out = w2.shape[1]
    M = B * N
    x2d = x.reshape(M, C_in)
    out_dtype = x.dtype

    if vmem_limit_bytes is None:
        vmem_limit_bytes = _default_vmem_limit_bytes()

    # Token-tile: multiple of the dtype's sublane packing, capped near M.
    sublane = 16 if x.dtype == jnp.bfloat16 else 8
    tm = min(tm, _round_up(M, sublane))
    tm = max(sublane, (tm // sublane) * sublane)

    # Hidden-chunk size: keep streamed weight chunks + the f32 intermediate
    # inside the VMEM budget (tk must evenly divide C_hidden so no garbage
    # chunk ever enters the accumulator).
    w_item = w1.dtype.itemsize
    budget = int(vmem_limit_bytes * 0.70)

    def _vmem_use(t):
        streamed = 2 * (C_in * t + t * C_out + t) * w_item       # w1/b1/w2 chunks (2-buf)
        fixed = (2 * tm * C_in * x.dtype.itemsize                # x tiles (2-buf)
                 + 2 * tm * C_out * out_dtype.itemsize           # out tiles (2-buf)
                 + tm * C_out * 4                                # f32 accumulator
                 + 2 * C_out * w_item)                           # b2
        temp = tm * t * 4                                        # f32 fc1 intermediate
        return streamed + fixed + temp

    if tk is None:
        if C_hidden <= 128 or _vmem_use(C_hidden) <= budget:
            tk = C_hidden
        else:
            cands = [t for t in range(128, C_hidden, 128) if C_hidden % t == 0]
            fitting = [t for t in cands if _vmem_use(t) <= budget]
            if fitting:
                tk = max(fitting)
            elif cands:
                tk = min(cands)
            else:
                tk = C_hidden  # no clean 128-multiple divisor: keep whole hidden dim
    assert C_hidden % tk == 0, "hidden chunk must evenly divide hidden_features"

    grid = (pl.cdiv(M, tm), C_hidden // tk)

    b1_2d = b1.reshape(1, C_hidden)
    b2_2d = b2.reshape(1, C_out)

    nbytes = lambda a: a.size * a.dtype.itemsize
    cost = pl.CostEstimate(
        flops=2 * M * C_hidden * (C_in + C_out),
        transcendentals=M * C_hidden,
        bytes_accessed=(nbytes(x2d) + nbytes(w1) + nbytes(w2)
                        + nbytes(b1) + nbytes(b2)
                        + M * C_out * out_dtype.itemsize),
    )

    out2d = pl.pallas_call(
        _mlp_kernel,
        out_shape=jax.ShapeDtypeStruct((M, C_out), out_dtype),
        grid_spec=pltpu.PrefetchScalarGridSpec(
            num_scalar_prefetch=0,
            grid=grid,
            in_specs=[
                # Token tile: streamed / double-buffered over the M axis.
                pl.BlockSpec((tm, C_in), lambda i, k: (i, 0)),
                # Weight / bias chunks: streamed over the hidden-chunk axis.
                pl.BlockSpec((C_in, tk), lambda i, k: (0, k)),
                pl.BlockSpec((1, tk), lambda i, k: (0, k)),
                pl.BlockSpec((tk, C_out), lambda i, k: (k, 0)),
                pl.BlockSpec((1, C_out), lambda i, k: (0, 0)),
            ],
            # Output tile resident across the hidden-chunk axis; written once.
            out_specs=pl.BlockSpec((tm, C_out), lambda i, k: (i, 0)),
            scratch_shapes=[pltpu.VMEM((tm, C_out), jnp.float32)],
        ),
        compiler_params=pltpu.CompilerParams(
            dimension_semantics=("parallel", "arbitrary"),
            vmem_limit_bytes=int(vmem_limit_bytes),
        ),
        cost_estimate=cost,
    )(x2d, w1, b1_2d, w2, b2_2d)

    return out2d.reshape(B, N, C_out)


def mlp_reference(x, w1, b1, w2, b2):
    """Pure-JAX reference matching the PyTorch forward semantics."""
    h = jnp.dot(x, w1, precision=jax.lax.Precision.HIGHEST) + b1
    c = jnp.sqrt(2.0 / jnp.pi)
    h = 0.5 * h * (1.0 + jnp.tanh(c * (h + 0.044715 * h ** 3)))
    return jnp.dot(h, w2, precision=jax.lax.Precision.HIGHEST) + b2


def _make_params(key, c_in, c_hidden, c_out, dtype):
    k1, kb1, k2, kb2 = jax.random.split(key, 4)
    w1 = jax.random.normal(k1, (c_in, c_hidden), dtype=dtype) * 0.05
    b1 = jax.random.normal(kb1, (c_hidden,), dtype=dtype) * 0.05
    w2 = jax.random.normal(k2, (c_hidden, c_out), dtype=dtype) * 0.05
    b2 = jax.random.normal(kb2, (c_out,), dtype=dtype) * 0.05
    return w1, b1, w2, b2


if __name__ == "__main__":
    key = jax.random.PRNGKey(0)
    k_small, k_chunk = jax.random.split(key, 2)

    # Test 1: small shapes consistent with the module (single hidden chunk).
    kx, kp = jax.random.split(k_small)
    batch, seq, c_in, c_hidden, c_out = 2, 8, 32, 64, 32
    x = jax.random.normal(kx, (batch, seq, c_in), dtype=jnp.float32)
    w1, b1, w2, b2 = _make_params(kp, c_in, c_hidden, c_out, jnp.float32)
    out = jax.block_until_ready(mlp_pallas(x, w1, b1, w2, b2))
    ref = mlp_reference(x, w1, b1, w2, b2)
    assert out.shape == (batch, seq, c_out)
    assert jnp.allclose(out, ref, atol=1e-4, rtol=1e-4), "mismatch vs reference (small)"

    # Test 2: exercises the hidden-chunk accumulator path (tk < hidden) and the
    # masked partial trailing token tile (M = 15 not a multiple of the tile).
    kx2, kp2 = jax.random.split(k_chunk)
    batch2, seq2, c_in2, c_hidden2, c_out2 = 3, 5, 128, 256, 128
    x2 = jax.random.normal(kx2, (batch2, seq2, c_in2), dtype=jnp.float32)
    w1b, b1b, w2b, b2b = _make_params(kp2, c_in2, c_hidden2, c_out2, jnp.float32)
    out2 = jax.block_until_ready(mlp_pallas(x2, w1b, b1b, w2b, b2b, tk=128))
    ref2 = mlp_reference(x2, w1b, b1b, w2b, b2b)
    assert out2.shape == (batch2, seq2, c_out2)
    assert jnp.allclose(out2, ref2, atol=1e-4, rtol=1e-4), "mismatch vs reference (chunked)"

    print("KERNEL_OK")
</pallas_src>

<mosaic_0001>
module attributes {stable_mosaic.version = 11 : i64} {
  func.func @_mlp_kernel(%arg0: i32, %arg1: i32, %arg2: memref<16x32xf32, #tpu.memory_space<vmem>>, %arg3: memref<32x64xf32, #tpu.memory_space<vmem>>, %arg4: memref<1x64xf32, #tpu.memory_space<vmem>>, %arg5: memref<64x32xf32, #tpu.memory_space<vmem>>, %arg6: memref<1x32xf32, #tpu.memory_space<vmem>>, %arg7: memref<16x32xf32, #tpu.memory_space<vmem>>, %arg8: memref<16x32xf32, #tpu.memory_space<vmem>>) attributes {dimension_semantics = [#tpu.dimension_semantics<parallel>, #tpu.dimension_semantics<arbitrary>], iteration_bounds = array<i64: 1, 1>, scalar_prefetch = 0 : i64, scratch_operands = 1 : i64, tpu.core_type = #tpu.core_type<tc>, window_params = [{transform_indices = @transform_0, window_bounds = array<i64: 16, 32>}, {transform_indices = @transform_1, window_bounds = array<i64: 32, 64>}, {transform_indices = @transform_2, window_bounds = array<i64: 1, 64>}, {transform_indices = @transform_3, window_bounds = array<i64: 64, 32>}, {pipeline_mode = #tpu.pipeline_mode<synchronous>, transform_indices = @transform_4, window_bounds = array<i64: 1, 32>}, {transform_indices = @transform_5, window_bounds = array<i64: 16, 32>}]} {
    %c0_i32 = arith.constant 0 : i32
    %0 = arith.cmpi eq, %arg1, %c0_i32 : i32
    %1 = arith.extui %0 : i1 to i32
    %c0_i32_0 = arith.constant 0 : i32
    %2 = arith.cmpi ne, %1, %c0_i32_0 : i32
    scf.if %2 {
      %cst_19 = arith.constant 0.000000e+00 : f32
      %30 = vector.broadcast %cst_19 : f32 to vector<16x32xf32>
      %c0_20 = arith.constant 0 : index
      %c0_21 = arith.constant 0 : index
      %31 = vector.load %arg8[%c0_20, %c0_21] : memref<16x32xf32, #tpu.memory_space<vmem>>, vector<16x32xf32>
      tpu.vector_store %arg8[%c0_20, %c0_21], %30 {strides = array<i32>} : memref<16x32xf32, #tpu.memory_space<vmem>>, vector<16x32xf32>,
    } else {
    }
    %c0 = arith.constant 0 : index
    %c0_1 = arith.constant 0 : index
    %3 = vector.load %arg2[%c0, %c0_1] : memref<16x32xf32, #tpu.memory_space<vmem>>, vector<16x32xf32>
    %c0_2 = arith.constant 0 : index
    %c0_3 = arith.constant 0 : index
    %4 = vector.load %arg3[%c0_2, %c0_3] : memref<32x64xf32, #tpu.memory_space<vmem>>, vector<32x64xf32>
    %cst = arith.constant dense<0.000000e+00> : vector<16x64xf32>
    %5 = tpu.matmul %3, %4, %cst {dimension_numbers = #tpu.dot_dimension_numbers<[1], [0], [0], [1], [0, 0, 1, 1], [], []>} : vector<16x32xf32>, vector<32x64xf32>, vector<16x64xf32> -> vector<16x64xf32>
    %c0_4 = arith.constant 0 : index
    %c0_5 = arith.constant 0 : index
    %6 = vector.load %arg4[%c0_4, %c0_5] : memref<1x64xf32, #tpu.memory_space<vmem>>, vector<1x64xf32>
    %7 = vector.broadcast %6 : vector<1x64xf32> to vector<16x64xf32>
    %8 = arith.addf %5, %7 : vector<16x64xf32>
    %cst_6 = arith.constant 5.000000e-01 : f32
    %9 = vector.broadcast %cst_6 : f32 to vector<16x64xf32>
    %10 = arith.mulf %9, %8 : vector<16x64xf32>
    %11 = arith.mulf %8, %8 : vector<16x64xf32>
    %12 = arith.mulf %11, %8 : vector<16x64xf32>
    %cst_7 = arith.constant 4.471500e-02 : f32
    %13 = vector.broadcast %cst_7 : f32 to vector<16x64xf32>
    %14 = arith.mulf %13, %12 : vector<16x64xf32>
    %15 = arith.addf %8, %14 : vector<16x64xf32>
    %cst_8 = arith.constant 0.797884583 : f32
    %16 = vector.broadcast %cst_8 : f32 to vector<16x64xf32>
    %17 = arith.mulf %16, %15 : vector<16x64xf32>
    %18 = math.tanh %17 : vector<16x64xf32>
    %cst_9 = arith.constant 1.000000e+00 : f32
    %19 = vector.broadcast %cst_9 : f32 to vector<16x64xf32>
    %20 = arith.addf %19, %18 : vector<16x64xf32>
    %21 = arith.mulf %10, %20 : vector<16x64xf32>
    %c0_10 = arith.constant 0 : index
    %c0_11 = arith.constant 0 : index
    %22 = vector.load %arg8[%c0_10, %c0_11] : memref<16x32xf32, #tpu.memory_space<vmem>>, vector<16x32xf32>
    %c0_12 = arith.constant 0 : index
    %c0_13 = arith.constant 0 : index
    %23 = vector.load %arg5[%c0_12, %c0_13] : memref<64x32xf32, #tpu.memory_space<vmem>>, vector<64x32xf32>
    %cst_14 = arith.constant dense<0.000000e+00> : vector<16x32xf32>
    %24 = tpu.matmul %21, %23, %cst_14 {dimension_numbers = #tpu.dot_dimension_numbers<[1], [0], [0], [1], [0, 0, 1, 1], [], []>} : vector<16x64xf32>, vector<64x32xf32>, vector<16x32xf32> -> vector<16x32xf32>
    %25 = arith.addf %22, %24 : vector<16x32xf32>
    %c0_15 = arith.constant 0 : index
    %c0_16 = arith.constant 0 : index
    %26 = vector.load %arg8[%c0_15, %c0_16] : memref<16x32xf32, #tpu.memory_space<vmem>>, vector<16x32xf32>
    tpu.vector_store %arg8[%c0_15, %c0_16], %25 {strides = array<i32>} : memref<16x32xf32, #tpu.memory_space<vmem>>, vector<16x32xf32>,
    %c0_i32_17 = arith.constant 0 : i32
    %27 = arith.cmpi eq, %arg1, %c0_i32_17 : i32
    %28 = arith.extui %27 : i1 to i32
    %c0_i32_18 = arith.constant 0 : i32
    %29 = arith.cmpi ne, %28, %c0_i32_18 : i32
    scf.if %29 {
      %c0_19 = arith.constant 0 : index
      %c0_20 = arith.constant 0 : index
      %30 = vector.load %arg8[%c0_19, %c0_20] : memref<16x32xf32, #tpu.memory_space<vmem>>, vector<16x32xf32>
      %c0_21 = arith.constant 0 : index
      %c0_22 = arith.constant 0 : index
      %31 = vector.load %arg6[%c0_21, %c0_22] : memref<1x32xf32, #tpu.memory_space<vmem>>, vector<1x32xf32>
      %32 = vector.broadcast %31 : vector<1x32xf32> to vector<16x32xf32>
      %33 = arith.addf %30, %32 : vector<16x32xf32>
      %c0_23 = arith.constant 0 : index
      %c0_24 = arith.constant 0 : index
      %34 = vector.load %arg7[%c0_23, %c0_24] : memref<16x32xf32, #tpu.memory_space<vmem>>, vector<16x32xf32>
      tpu.vector_store %arg7[%c0_23, %c0_24], %33 {strides = array<i32>} : memref<16x32xf32, #tpu.memory_space<vmem>>, vector<16x32xf32>,
    } else {
    }
    return
  }
  func.func @transform_0(%arg0: i32, %arg1: i32) -> (i32, i32) {
    %c0_i32 = arith.constant 0 : i32
    %c0_i32_0 = arith.constant 0 : i32
    return %arg0, %c0_i32 : i32, i32
  }
  func.func @transform_1(%arg0: i32, %arg1: i32) -> (i32, i32) {
    %c0_i32 = arith.constant 0 : i32
    %c0_i32_0 = arith.constant 0 : i32
    return %c0_i32, %arg1 : i32, i32
  }
  func.func @transform_2(%arg0: i32, %arg1: i32) -> (i32, i32) {
    %c0_i32 = arith.constant 0 : i32
    %c0_i32_0 = arith.constant 0 : i32
    return %c0_i32, %arg1 : i32, i32
  }
  func.func @transform_3(%arg0: i32, %arg1: i32) -> (i32, i32) {
    %c0_i32 = arith.constant 0 : i32
    %c0_i32_0 = arith.constant 0 : i32
    return %arg1, %c0_i32 : i32, i32
  }
  func.func @transform_4(%arg0: i32, %arg1: i32) -> (i32, i32) {
    %c0_i32 = arith.constant 0 : i32
    %c0_i32_0 = arith.constant 0 : i32
    %c0_i32_1 = arith.constant 0 : i32
    return %c0_i32, %c0_i32_0 : i32, i32
  }
  func.func @transform_5(%arg0: i32, %arg1: i32) -> (i32, i32) {
    %c0_i32 = arith.constant 0 : i32
    %c0_i32_0 = arith.constant 0 : i32
    return %arg0, %c0_i32 : i32, i32
  }
}

</mosaic_0001>

<bundles_post_ra>
// kernel: tpu_custom_call.1
= control target key start
LH: loop header
LB: loop body
LE: loop exit
PB: predicated region body
PF: predicated region fallthrough
CT: control target
= control target key end

     0   :  { %s306_s0 = inlined_call_operand.vmem [shape: f32[16,32], index: 0, kind: input, shape index: {}]   ;;  %s307_s1 = inlined_call_operand.vmem [shape: f32[32,64], index: 1, kind: input, shape index: {}]   ;;  %s308_s2 = inlined_call_operand.vmem [shape: f32[1,64], index: 2, kind: input, shape index: {}]   ;;  %s309_s3 = inlined_call_operand.vmem [shape: f32[64,32], index: 3, kind: input, shape index: {}]   ;;  %s310_s4 = inlined_call_operand.vmem [shape: f32[1,32], index: 4, kind: input, shape index: {}]   ;;  %s311_s5 = inlined_call_operand.hbm [shape: f32[16,32], index: 5, kind: output, shape index: {}]  }
   0x1   :  { %v33_v0 = vld [vmem:[%s307_s1 + $0x18] sm:$0xff]  ;;  %v32_v1 = vld [vmem:[%s307_s1 + $0x10] sm:$0xff]  ;;  %v31_v2 = vld [vmem:[%s307_s1 + $0x8] sm:$0xff] }
   0x2   :  { %57 = vmatpush.msra.mxu0 %v33_v0  ;;  %165 = vmatpush.msra.mxu3 %v33_v0 }
   0x3   :  { %10 = vsyncpa [#allocation4], 0  ;;  %v30_v3 = vld [vmem:[%s307_s1] sm:$0xff]  ;;  %vm25_vm0 = vcmask 261120   ;;  %v29_v5 = vld [vmem:[%s306_s0 + $0x8] sm:$0xff]  ;;  %v213_v15 = vmov 0.0  }
   0x4   :  { %58 = vmatpush.msra.mxu0 %v32_v1  ;;  %166 = vmatpush.msra.mxu3 %v32_v1  ;;  %v28_v4 = vld [vmem:[%s306_s0] sm:$0xff]  ;;  %v95_v6 = vld [vmem:[%s309_s3 + $0x38] sm:$0xff]  ;;  %v94_v7 = vld [vmem:[%s309_s3 + $0x30] sm:$0xff]  ;;  %26 = vst.msk [vmem:[#allocation2] sm:$0xff] %vm25_vm0, %v213_v15  ;;  %vm96_vm1 = vcmask 523264   ;;  %s214_s21 = smov [#allocation3]  }
   0x5   :  { %111 = vmatpush.msra.mxu1 %v95_v6  ;;  %169 = vmatpush.msra.mxu2 %v95_v6  ;;  %v93_v8 = vld [vmem:[%s309_s3 + $0x28] sm:$0xff]  ;;  %v92_v9 = vld [vmem:[%s309_s3 + $0x20] sm:$0xff]  ;;  %v91_v10 = vld [vmem:[%s309_s3 + $0x18] sm:$0xff]  ;;  %27 = vst.msk [vmem:[#allocation2 + $0x8] sm:$0xff] %vm25_vm0, %v213_v15  ;;  %s147_s22 = sshll.u32 %s214_s21, 4  ;;  %s149_s25 = sshll.u32 %s311_s5, 4  ;;  %s148_s22 = int_to_ptr.vmem [resolvable:$true] %s147_s22  ;;  %s150_s25 = int_to_ptr.hbm [resolvable:$true] %s149_s25 }
   0x6   :  { %59 = vmatpush.msra.mxu0 %v31_v2  ;;  %167 = vmatpush.msra.mxu3 %v31_v2  ;;  %v90_v11 = vld [vmem:[%s309_s3 + $0x10] sm:$0xff]  ;;  %v89_v12 = vld [vmem:[%s309_s3 + $0x8] sm:$0xff]  ;;  %v88_v13 = vld [vmem:[%s309_s3] sm:$0xff]  ;;  %s216_s26 = smov 8  }
   0x7   :  { %112 = vmatpush.msra.mxu1 %v94_v7  ;;  %170 = vmatpush.msra.mxu2 %v94_v7  ;;  %v181_v14 = vld [vmem:[%s308_s2] ss:$0 sm:$0xff] }
   0x8   :  { %60 = vmatpush.msra.mxu0 %v30_v3  ;;  %168 = vmatpush.msra.mxu3 %v30_v3  ;;  %v182_v41 = vld [vmem:[%s310_s4] ss:$0 sm:$0xff]  ;;  %s215_s4 = smov 128  }
   0x9   :  { %161 = vmatmul.msk.f32.vlgmr.msra.gmra.mxu0 %vm25_vm0, %v28_v4  ;;  %162 = vmatmul.msk.f32.vlgmr.msra.gmra.mxu3 %vm25_vm0, %v29_v5 }
   0xa   :  { %113 = vmatpush.msra.mxu1 %v93_v8  ;;  %171 = vmatpush.msra.mxu2 %v93_v8 }
   0xb   :  { %v86_v38 = vld [vmem:[#allocation2] sm:$0xff] }
   0xc   :  { %114 = vmatpush.msra.mxu1 %v92_v9  ;;  %172 = vmatpush.msra.mxu2 %v92_v9  ;;  %v87_v42 = vld [vmem:[#allocation2 + $0x8] sm:$0xff] }
   0xe   :  { %115 = vmatpush.msra.mxu1 %v91_v10  ;;  %173 = vmatpush.msra.mxu2 %v91_v10 }
  0x10   :  { %116 = vmatpush.msra.mxu1 %v90_v11  ;;  %174 = vmatpush.msra.mxu2 %v90_v11 }
  0x12   :  { %117 = vmatpush.msra.mxu1 %v89_v12  ;;  %175 = vmatpush.msra.mxu2 %v89_v12 }
  0x14   :  { %118 = vmatpush.msra.mxu1 %v88_v13  ;;  %176 = vmatpush.msra.mxu2 %v88_v13 }
  0x86   :  { %v62_v16 = vpop.f32.mrf.mxu0 }
  0x87   :  { %v63_v17 = vadd.f32 %v181_v14, %v62_v16 }
  0x89   :  { %v70_v18 = vmul.f32 %v63_v17, %v63_v17  ;;  %v68_v31 = vmul.f32 0.5, %v63_v17 }
  0x8b   :  { %v72_v19 = vmul.f32 %v70_v18, %v63_v17 }
  0x8c   :  { %v65_v20 = vpop.f32.mrf.mxu3 }
  0x8d   :  { %v74_v21 = vmul.f32 0.044715, %v72_v19  ;;  %v66_v22 = vadd.f32 %v181_v14, %v65_v20 }
  0x8f   :  { %v76_v23 = vadd.f32 %v74_v21, %v63_v17  ;;  %v71_v24 = vmul.f32 %v66_v22, %v66_v22  ;;  %v69_v35 = vmul.f32 0.5, %v66_v22 }
  0x91   :  { %v73_v25 = vmul.f32 %v71_v24, %v66_v22  ;;  %v78_v26 = vmul.f32 0.7978846, %v76_v23 }
  0x93   :  { %v75_v27 = vmul.f32 0.044715, %v73_v25  ;;  %183 = vtanh.f32 %v78_v26 }
  0x95   :  { %v77_v28 = vadd.f32 %v75_v27, %v66_v22 }
  0x97   :  { %v79_v29 = vmul.f32 0.7978846, %v77_v28 }
  0x99   :  { %v184_v30 = vpop.eup %183  ;;  %185 = vtanh.f32 %v79_v29 }
  0x9a   :  { %v82_v32 = vadd.f32 1.0, %v184_v30 }
  0x9c   :  { %v84_v33 = vmul.f32 %v82_v32, %v68_v31 }
  0x9e   :  { %163 = vmatmul.msk.f32.vlgmr.msra.gmra.mxu1 %vm96_vm1, %v84_v33 }
  0x9f   :  { %v186_v34 = vpop.eup %185 }
  0xa0   :  { %v83_v36 = vadd.f32 1.0, %v186_v34 }
  0xa2   :  { %v85_v37 = vmul.f32 %v83_v36, %v69_v35 }
  0xa4   :  { %164 = vmatmul.msk.f32.vlgmr.msra.gmra.mxu2 %vm96_vm1, %v85_v37 }
 0x11b   :  { %v120_v39 = vpop.f32.mrf.mxu1 }
 0x11c   :  { %v126_v40 = vadd.f32 %v120_v39, %v86_v38 }
 0x11e   :  { %128 = vst.msk [vmem:[#allocation2] sm:$0xff] %vm25_vm0, %v126_v40 }
 0x125   :  { %v133_v43 = vld [vmem:[#allocation2] sm:$0xff] }
 0x126   :  { %v139_v44 = vadd.f32 %v182_v41, %v133_v43 }
 0x127   :  { %v123_v45 = vpop.f32.mrf.mxu2 }
 0x128   :  { %v127_v46 = vadd.f32 %v123_v45, %v87_v42  ;;  %141 = vst.msk [vmem:[#allocation3] sm:$0xff] %vm25_vm0, %v139_v44 }
 0x12a   :  { %129 = vst.msk [vmem:[#allocation2 + $0x8] sm:$0xff] %vm25_vm0, %v127_v46 }
 0x131   :  { %v134_v47 = vld [vmem:[#allocation2 + $0x8] sm:$0xff] }
 0x132   :  { %v140_v48 = vadd.f32 %v182_v41, %v134_v47 }
 0x134   :  { %142 = vst.msk [vmem:[#allocation3 + $0x8] sm:$0xff] %vm25_vm0, %v140_v48 }
 0x135   :  { %155 = dma.vmem_to_hbm [thread:$0]  %s148_s22, 256, %s150_s25, [#allocation4], %s215_s4, %s215_s4, %s216_s26  }
 0x136   :  { %211 = dma.done.wait [#allocation4], 256  }
 0x137   :  { %212 = vsyncadd [#allocation4], 4294967040 }
 0x138   :  { %160 = vsyncpa [#allocation4], 1 }

</bundles_post_ra>
